<compile_context>
chip_gen: v5e
topology: v5e:2x2
jax: 0.10.0
libtpu: 0.0.40
codegen_flags: <defaults>
</compile_context>

<pallas_src>
import jax
import jax.numpy as jnp
from jax import lax
from jax.experimental import pallas as pl
from jax.experimental.pallas import tpu as pltpu

EPS = 1e-5                      # nn.InstanceNorm2d default
VMEM_LIMIT = 48 * 1024 * 1024   # explicit scoped VMEM; <=~48-56 MiB keeps v7x headroom


def conv_block(x, weight, bias=None, *, kernel_size=3, padding=1, eps=EPS,
               use_activation=True, row_tile=8):
    """x: (N, Cin, H, W) f32, weight: (Cout, Cin, K, K) f32.

    `bias` is accepted but ignored: the conv bias is mathematically cancelled by the
    InstanceNorm (affine=False) mean subtraction — do NOT reuse this with a different
    norm configuration.
    """
    del bias
    N, Cin, H, W = x.shape
    Cout = weight.shape[0]
    K = kernel_size
    assert K == 2 * padding + 1, "kernel assumes a 'same' convolution"
    Hp, Wp = H + 2 * padding, W + 2 * padding
    TH = row_tile
    assert H % TH == 0, "H must be divisible by the row tile"
    THW = TH * W
    assert THW % 128 == 0, "output tile must be lane-dense (multiple of 128)"
    assert W % 16 == 0, "W must be a multiple of 16 (bf16 sublane packing)"
    n_tiles = H // TH
    HW = H * W
    KKC = K * K * Cin

    # --- glue: ONE fused XLA pass (cast -> reflect pad -> NHWC), ~0.5x input bytes ---
    xp = jnp.pad(x.astype(jnp.bfloat16),
                 ((0, 0), (0, 0), (padding, padding), (padding, padding)),
                 mode="reflect")
    xp = xp.transpose(0, 2, 3, 1)                                   # (N, Hp, Wp, Cin)
    # weight layout matches patches layout: column index = (i*K + j)*Cin + c
    w2 = weight.transpose(0, 2, 3, 1).reshape(Cout, KKC).astype(jnp.bfloat16)

    # ---------------- kernel A: conv tile (fused matmul) + per-tile stats ----------
    def conv_stats_kernel(x_ref, w_ref, o_ref, sum_ref, sq_ref):
        # x_ref: (Hp, Wp, Cin) bf16 (full padded sample, resident across row tiles)
        # w_ref: (Cout, K*K*Cin) bf16
        # o_ref: (Cout, THW) f32   sum_ref/sq_ref: (Cout, 1) f32
        t = pl.program_id(1)
        r0 = pl.multiple_of(t * TH, TH)
        xt = x_ref[pl.ds(r0, TH + 2 * padding), :, :]       # (TH+2p, Wp, Cin)
        # 3 W-shifted planes, built once per tile and reused across the K row offsets
        # (row offsets are free leading-dim address offsets).
        planes = [xt[:, j:j + W, :].reshape((TH + 2 * padding) * W, Cin)
                  for j in range(K)]
        taps = [planes[j][i * W:i * W + THW] for i in range(K) for j in range(K)]
        patches = jnp.concatenate(taps, axis=-1)            # (THW, K*K*Cin) bf16
        # single MXU matmul, contraction depth K*K*Cin, lane-dense (Cout, THW) result
        acc = lax.dot_general(w_ref[...], patches,
                              dimension_numbers=(((1,), (1,)), ((), ())),
                              preferred_element_type=jnp.float32)
        o_ref[...] = acc
        sum_ref[...] = jnp.sum(acc, axis=1, keepdims=True)
        sq_ref[...] = jnp.sum(acc * acc, axis=1, keepdims=True)

    conv_out, tsum, tsq = pl.pallas_call(
        conv_stats_kernel,
        out_shape=(
            jax.ShapeDtypeStruct((N, Cout, HW), jnp.float32),
            jax.ShapeDtypeStruct((N, n_tiles, Cout, 1), jnp.float32),
            jax.ShapeDtypeStruct((N, n_tiles, Cout, 1), jnp.float32),
        ),
        grid_spec=pltpu.PrefetchScalarGridSpec(
            num_scalar_prefetch=0,
            grid=(N, n_tiles),
            in_specs=[
                pl.BlockSpec((None, Hp, Wp, Cin), lambda n, t: (n, 0, 0, 0)),
                pl.BlockSpec((Cout, KKC), lambda n, t: (0, 0)),
            ],
            out_specs=(
                pl.BlockSpec((None, Cout, THW), lambda n, t: (n, 0, t)),
                pl.BlockSpec((None, None, Cout, 1), lambda n, t: (n, t, 0, 0)),
                pl.BlockSpec((None, None, Cout, 1), lambda n, t: (n, t, 0, 0)),
            ),
        ),
        compiler_params=pltpu.CompilerParams(
            dimension_semantics=("parallel", "parallel"),  # tiles independent -> megacore OK at N=1
            vmem_limit_bytes=VMEM_LIMIT),
    )(xp, w2)

    # ------------- tiny cross-tile stat reduction (N*n_tiles*Cout elements) --------
    inv_hw = 1.0 / HW
    mean = jnp.sum(tsum, axis=1) * inv_hw                   # (N, Cout, 1)
    var = jnp.sum(tsq, axis=1) * inv_hw - mean * mean
    var = jnp.maximum(var, 0.0)                             # guard one-pass cancellation
    scale = lax.rsqrt(var + eps)
    shift = -mean * scale

    # ---------------- kernel B: per-tile normalize + ReLU ---------------------------
    def norm_relu_kernel(c_ref, s_ref, b_ref, o_ref):
        y = c_ref[...] * s_ref[...] + b_ref[...]
        if use_activation:
            y = jnp.maximum(y, 0.0)
        o_ref[...] = y.astype(o_ref.dtype)

    out = pl.pallas_call(
        norm_relu_kernel,
        out_shape=jax.ShapeDtypeStruct((N, Cout, HW), jnp.float32),
        grid_spec=pltpu.PrefetchScalarGridSpec(
            num_scalar_prefetch=0,
            grid=(N, n_tiles),
            in_specs=[
                pl.BlockSpec((None, Cout, THW), lambda n, t: (n, 0, t)),
                pl.BlockSpec((None, Cout, 1), lambda n, t: (n, 0, 0)),
                pl.BlockSpec((None, Cout, 1), lambda n, t: (n, 0, 0)),
            ],
            out_specs=pl.BlockSpec((None, Cout, THW), lambda n, t: (n, 0, t)),
        ),
        compiler_params=pltpu.CompilerParams(
            dimension_semantics=("parallel", "parallel"),
            vmem_limit_bytes=VMEM_LIMIT),
    )(conv_out, scale, shift)

    # (N, Cout, HW) is already NCHW-ordered -> free reshape, no transpose
    return out.reshape(N, Cout, H, W)


if __name__ == "__main__":
    key = jax.random.PRNGKey(0)
    k_x, k_w, k_b = jax.random.split(key, 3)

    N, Cin, H, W = 2, 4, 16, 16
    Cout, K = 8, 3

    x = jax.random.normal(k_x, (N, Cin, H, W), dtype=jnp.float32)
    weight = jax.random.normal(k_w, (Cout, Cin, K, K), dtype=jnp.float32) * 0.1
    bias = jax.random.normal(k_b, (Cout,), dtype=jnp.float32) * 0.1

    y = conv_block(x, weight, bias, kernel_size=K, padding=1)
    jax.block_until_ready(y)

    # pure-JAX reference (includes conv bias -> demonstrates it cancels under IN)
    def reference(x_in, w_in, b_in):
        xr = jnp.pad(x_in, ((0, 0), (0, 0), (1, 1), (1, 1)), mode="reflect")
        r = lax.conv_general_dilated(
            xr, w_in, window_strides=(1, 1), padding="VALID",
            dimension_numbers=("NCHW", "OIHW", "NCHW"),
            precision=lax.Precision.HIGHEST) + b_in[None, :, None, None]
        m = r.mean(axis=(2, 3), keepdims=True)
        v = ((r - m) ** 2).mean(axis=(2, 3), keepdims=True)
        return jnp.maximum((r - m) * lax.rsqrt(v + EPS), 0.0)

    ref_f32 = reference(x, weight, bias)
    # reference with operands rounded to bf16 (exactly what the MXU consumes) ->
    # isolates kernel correctness from the deliberate bf16 operand quantization.
    ref_bf16ops = reference(x.astype(jnp.bfloat16).astype(jnp.float32),
                            weight.astype(jnp.bfloat16).astype(jnp.float32), bias)

    err_exact = float(jnp.max(jnp.abs(y - ref_bf16ops)))
    err_full = float(jnp.max(jnp.abs(y - ref_f32)))
    assert err_exact < 2e-3, f"mismatch vs bf16-operand reference: {err_exact}"
    assert err_full < 6e-2, f"mismatch vs pure-f32 reference: {err_full}"   # bf16 quantization bound

    print("KERNEL_OK")
</pallas_src>

<mosaic_0001>
module attributes {stable_mosaic.version = 11 : i64} {
  func.func @conv_stats_kernel(%arg0: i32, %arg1: i32, %arg2: memref<1x18x18x4xbf16, #tpu.memory_space<vmem>>, %arg3: memref<8x36xbf16, #tpu.memory_space<vmem>>, %arg4: memref<1x8x128xf32, #tpu.memory_space<vmem>>, %arg5: memref<1x1x8x1xf32, #tpu.memory_space<vmem>>, %arg6: memref<1x1x8x1xf32, #tpu.memory_space<vmem>>) attributes {dimension_semantics = [#tpu.dimension_semantics<parallel>, #tpu.dimension_semantics<parallel>], iteration_bounds = array<i64: 2, 2>, scalar_prefetch = 0 : i64, scratch_operands = 0 : i64, tpu.core_type = #tpu.core_type<tc>, window_params = [{transform_indices = @transform_0, window_bounds = array<i64: 1, 18, 18, 4>}, {pipeline_mode = #tpu.pipeline_mode<synchronous>, transform_indices = @transform_1, window_bounds = array<i64: 8, 36>}, {transform_indices = @transform_2, window_bounds = array<i64: 1, 8, 128>}, {transform_indices = @transform_3, window_bounds = array<i64: 1, 1, 8, 1>}, {transform_indices = @transform_4, window_bounds = array<i64: 1, 1, 8, 1>}]} {
    %c8_i32 = arith.constant 8 : i32
    %0 = arith.muli %arg1, %c8_i32 : i32
    %1 = tpu.assume_multiple %0, 8 : i32
    %c0 = arith.constant 0 : index
    %2 = arith.index_cast %1 : i32 to index
    %c0_0 = arith.constant 0 : index
    %c0_1 = arith.constant 0 : index
    %3 = vector.load %arg2[%c0, %2, %c0_0, %c0_1] : memref<1x18x18x4xbf16, #tpu.memory_space<vmem>>, vector<1x10x18x4xbf16>
    %4 = vector.shape_cast %3 : vector<1x10x18x4xbf16> to vector<10x18x4xbf16>
    %5 = vector.extract_strided_slice %4 {offsets = [0, 0, 0], sizes = [10, 16, 4], strides = [1, 1, 1]} : vector<10x18x4xbf16> to vector<10x16x4xbf16>
    %6 = vector.shape_cast %5 : vector<10x16x4xbf16> to vector<160x4xbf16>
    %7 = vector.extract_strided_slice %4 {offsets = [0, 1, 0], sizes = [10, 16, 4], strides = [1, 1, 1]} : vector<10x18x4xbf16> to vector<10x16x4xbf16>
    %8 = vector.shape_cast %7 : vector<10x16x4xbf16> to vector<160x4xbf16>
    %9 = vector.extract_strided_slice %4 {offsets = [0, 2, 0], sizes = [10, 16, 4], strides = [1, 1, 1]} : vector<10x18x4xbf16> to vector<10x16x4xbf16>
    %10 = vector.shape_cast %9 : vector<10x16x4xbf16> to vector<160x4xbf16>
    %11 = vector.extract_strided_slice %6 {offsets = [0, 0], sizes = [128, 4], strides = [1, 1]} : vector<160x4xbf16> to vector<128x4xbf16>
    %12 = vector.extract_strided_slice %8 {offsets = [0, 0], sizes = [128, 4], strides = [1, 1]} : vector<160x4xbf16> to vector<128x4xbf16>
    %13 = vector.extract_strided_slice %10 {offsets = [0, 0], sizes = [128, 4], strides = [1, 1]} : vector<160x4xbf16> to vector<128x4xbf16>
    %14 = vector.extract_strided_slice %6 {offsets = [16, 0], sizes = [128, 4], strides = [1, 1]} : vector<160x4xbf16> to vector<128x4xbf16>
    %15 = vector.extract_strided_slice %8 {offsets = [16, 0], sizes = [128, 4], strides = [1, 1]} : vector<160x4xbf16> to vector<128x4xbf16>
    %16 = vector.extract_strided_slice %10 {offsets = [16, 0], sizes = [128, 4], strides = [1, 1]} : vector<160x4xbf16> to vector<128x4xbf16>
    %17 = vector.extract_strided_slice %6 {offsets = [32, 0], sizes = [128, 4], strides = [1, 1]} : vector<160x4xbf16> to vector<128x4xbf16>
    %18 = vector.extract_strided_slice %8 {offsets = [32, 0], sizes = [128, 4], strides = [1, 1]} : vector<160x4xbf16> to vector<128x4xbf16>
    %19 = vector.extract_strided_slice %10 {offsets = [32, 0], sizes = [128, 4], strides = [1, 1]} : vector<160x4xbf16> to vector<128x4xbf16>
    %20 = tpu.concatenate %11, %12, %13, %14, %15, %16, %17, %18, %19 in 1 : vector<128x4xbf16>, vector<128x4xbf16>, vector<128x4xbf16>, vector<128x4xbf16>, vector<128x4xbf16>, vector<128x4xbf16>, vector<128x4xbf16>, vector<128x4xbf16>, vector<128x4xbf16> -> vector<128x36xbf16>
    %c0_2 = arith.constant 0 : index
    %c0_3 = arith.constant 0 : index
    %21 = vector.load %arg3[%c0_2, %c0_3] : memref<8x36xbf16, #tpu.memory_space<vmem>>, vector<8x36xbf16>
    %cst = arith.constant dense<0.000000e+00> : vector<8x128xf32>
    %22 = tpu.matmul %21, %20, %cst {dimension_numbers = #tpu.dot_dimension_numbers<[1], [1], [0], [0], [0, 0, 1, 0], [], []>} : vector<8x36xbf16>, vector<128x36xbf16>, vector<8x128xf32> -> vector<8x128xf32>
    %c0_4 = arith.constant 0 : index
    %c0_5 = arith.constant 0 : index
    %c0_6 = arith.constant 0 : index
    %23 = vector.load %arg4[%c0_4, %c0_5, %c0_6] : memref<1x8x128xf32, #tpu.memory_space<vmem>>, vector<1x8x128xf32>
    %24 = vector.shape_cast %23 : vector<1x8x128xf32> to vector<8x128xf32>
    %25 = vector.shape_cast %22 : vector<8x128xf32> to vector<1x8x128xf32>
    tpu.vector_store %arg4[%c0_4, %c0_5, %c0_6], %25 {strides = array<i32>} : memref<1x8x128xf32, #tpu.memory_space<vmem>>, vector<1x8x128xf32>,
    %cst_7 = arith.constant dense<0.000000e+00> : vector<8xf32>
    %26 = vector.multi_reduction <add>, %22, %cst_7 [1] : vector<8x128xf32> to vector<8xf32>
    %27 = vector.shape_cast %26 : vector<8xf32> to vector<8x1xf32>
    %c0_8 = arith.constant 0 : index
    %c0_9 = arith.constant 0 : index
    %c0_10 = arith.constant 0 : index
    %c0_11 = arith.constant 0 : index
    %28 = vector.load %arg5[%c0_8, %c0_9, %c0_10, %c0_11] : memref<1x1x8x1xf32, #tpu.memory_space<vmem>>, vector<1x1x8x1xf32>
    %29 = vector.shape_cast %28 : vector<1x1x8x1xf32> to vector<8x1xf32>
    %30 = vector.shape_cast %27 : vector<8x1xf32> to vector<1x1x8x1xf32>
    tpu.vector_store %arg5[%c0_8, %c0_9, %c0_10, %c0_11], %30 {strides = array<i32>} : memref<1x1x8x1xf32, #tpu.memory_space<vmem>>, vector<1x1x8x1xf32>,
    %31 = arith.mulf %22, %22 : vector<8x128xf32>
    %cst_12 = arith.constant dense<0.000000e+00> : vector<8xf32>
    %32 = vector.multi_reduction <add>, %31, %cst_12 [1] : vector<8x128xf32> to vector<8xf32>
    %33 = vector.shape_cast %32 : vector<8xf32> to vector<8x1xf32>
    %c0_13 = arith.constant 0 : index
    %c0_14 = arith.constant 0 : index
    %c0_15 = arith.constant 0 : index
    %c0_16 = arith.constant 0 : index
    %34 = vector.load %arg6[%c0_13, %c0_14, %c0_15, %c0_16] : memref<1x1x8x1xf32, #tpu.memory_space<vmem>>, vector<1x1x8x1xf32>
    %35 = vector.shape_cast %34 : vector<1x1x8x1xf32> to vector<8x1xf32>
    %36 = vector.shape_cast %33 : vector<8x1xf32> to vector<1x1x8x1xf32>
    tpu.vector_store %arg6[%c0_13, %c0_14, %c0_15, %c0_16], %36 {strides = array<i32>} : memref<1x1x8x1xf32, #tpu.memory_space<vmem>>, vector<1x1x8x1xf32>,
    return
  }
  func.func @transform_0(%arg0: i32, %arg1: i32) -> (i32, i32, i32, i32) {
    %c0_i32 = arith.constant 0 : i32
    %c0_i32_0 = arith.constant 0 : i32
    %c0_i32_1 = arith.constant 0 : i32
    %c0_i32_2 = arith.constant 0 : i32
    return %arg0, %c0_i32, %c0_i32_0, %c0_i32_1 : i32, i32, i32, i32
  }
  func.func @transform_1(%arg0: i32, %arg1: i32) -> (i32, i32) {
    %c0_i32 = arith.constant 0 : i32
    %c0_i32_0 = arith.constant 0 : i32
    %c0_i32_1 = arith.constant 0 : i32
    return %c0_i32, %c0_i32_0 : i32, i32
  }
  func.func @transform_2(%arg0: i32, %arg1: i32) -> (i32, i32, i32) {
    %c0_i32 = arith.constant 0 : i32
    %c0_i32_0 = arith.constant 0 : i32
    return %arg0, %c0_i32, %arg1 : i32, i32, i32
  }
  func.func @transform_3(%arg0: i32, %arg1: i32) -> (i32, i32, i32, i32) {
    %c0_i32 = arith.constant 0 : i32
    %c0_i32_0 = arith.constant 0 : i32
    %c0_i32_1 = arith.constant 0 : i32
    return %arg0, %arg1, %c0_i32, %c0_i32_0 : i32, i32, i32, i32
  }
  func.func @transform_4(%arg0: i32, %arg1: i32) -> (i32, i32, i32, i32) {
    %c0_i32 = arith.constant 0 : i32
    %c0_i32_0 = arith.constant 0 : i32
    %c0_i32_1 = arith.constant 0 : i32
    return %arg0, %arg1, %c0_i32, %c0_i32_0 : i32, i32, i32, i32
  }
}

</mosaic_0001>

<bundles_post_ra>
// kernel: tpu_custom_call.1
= control target key start
LH: loop header
LB: loop body
LE: loop exit
PB: predicated region body
PF: predicated region fallthrough
CT: control target
= control target key end

     0   :  { %s2096_s0 = inlined_call_operand.vmem [shape: bf16[2,18,18,4], index: 0, kind: input, shape index: {}]   ;;  %s2097_s1 = inlined_call_operand.vmem [shape: bf16[8,36], index: 1, kind: input, shape index: {}]   ;;  %s2098_s2 = inlined_call_operand.hbm [shape: f32[2,8,256], index: 2, kind: output, shape index: {0}]   ;;  %s2099_s3 = inlined_call_operand.vmem [shape: f32[2,2,8,1], index: 3, kind: output, shape index: {1}]   ;;  %s2100_s4 = inlined_call_operand.vmem [shape: f32[2,2,8,1], index: 4, kind: output, shape index: {2}]  }
   0x1   :  { %2101 = sst [smem:[#allocation5_spill]] %s2096_s0 }
   0x2   :  { %10 = vsyncpa [#allocation3], 0 }
   0x3   :  { %12 = vsyncpa [#allocation3 + $0x1], 0  ;;  %s1512_s15 = smov 0   ;;  %s1514_s16 = smov 0  }
   0x4   :  { %s1516_s17 = smov 0   ;;  %s1518_s18 = smov 0  }
   0x5   :  { %s1520_s19 = smov 0   ;;  %s1522_s20 = smov 0  }
   0x6   :  { %s1524_s21 = smov 0   ;;  %s1526_s22 = smov 0  }
   0x7 LB: > { %s1222_s23 = sadd.s32 4294967295, %s1477_s22   ;;  %s1223_s24 = sadd.s32 4294967294, %s1477_s22   ;;  %s1477_s22 = sphi %s1526_s22, %s18_s22   ;;  %s1473_s21 = sphi %s1524_s21, %s2115_s21   ;;  %s1469_s20 = sphi %s1522_s20, %s2114_s20   ;;  %s1465_s19 = sphi %s1520_s19, %s2113_s19   ;;  %s1461_s18 = sphi %s1518_s18, %s2112_s18   ;;  %s1457_s17 = sphi %s1516_s17, %s2111_s17   ;;  %s1453_s16 = sphi %s1514_s16, %s2110_s16   ;;  %s1449_s15 = sphi %s1512_s15, %s2109_s15  }
   0x8   : > { %s27_s25 = sadd.s32 1, %s1469_s20  ;;  %s30_s26 = sadd.s32 1, %s1473_s21 }
   0x9   : > { %p28_p0 = scmp.ge.s32.totalorder %s27_s25, 2  ;;  %p96_p1 = scmp.ne.s32.totalorder %s1457_s17, %s1453_s16 }
   0xa   : > { %p97_p2 = scmp.eq.s32.totalorder %s1222_s23, 3  ;;  %p102_p5 = scmp.ne.s32.totalorder %s1453_s16, %s1449_s15 }
   0xb   : > { %s2117_s25 = smov (%p28_p0, %s27_s25), 0  ;;  %s2119_s26 = smov (!%p28_p0, %s30_s26), %s1473_s21 }
   0xc   : > { %s82_s27 = ssub.s32 %s1469_s20, %s2117_s25  ;;  %p1563_p3 = por %p97_p2, %p96_p1 }
   0xd   : > { %p32_p4 = scmp.ge.s32.totalorder %s2119_s26, 2  ;;  %p103_p6 = scmp.eq.s32.totalorder %s1223_s24, 3 }
   0xe   : > { %p1226_p7 = scmp.ge.s32.totalorder %s1477_s22, 1  ;;  %p188_p9 = scmp.lt.s32.totalorder %s1477_s22, 5 }
   0xf   : > { %s2121_s26 = smov (%p32_p4, %s2119_s26), 0  ;;  %p1572_p8 = por %p103_p6, %p102_p5 }
  0x10   : > { %s81_s30 = ssub.s32 %s1473_s21, %s2121_s26  ;;  %s86_s5 = sadd.s32 1, %s1457_s17 }
  0x11   : > { %s83_s6 = sor.u32 %s82_s27, %s81_s30  ;;  %p189_p10 = pnand %p1226_p7, %p188_p9 }
  0x12   : > { %p84_p11 = scmp.eq.s32.totalorder %s83_s6, 0  ;;  %p230_p12 = scmp.lt.s32.totalorder (!%p189_p10), %s1465_s19, 1 }
  0x13   : > { %192 = sbr.rel (%p189_p10) target bundleno = 579 (0x243), region = 28  ;;  %s2104_s0 = sld [smem:[#allocation5_spill]] (!%p189_p10) }
  0x14   : > { %s1581_s7 = scalar_select %p84_p11, %s1457_s17, %s86_s5  }
  0x15   : > { %s1292_s9 = smul.u32 (!%p189_p10), 96, %s1461_s18  ;;  %s1479_s23 = smov (!%p189_p10), 12  }
  0x16   : > { %s1480_s24 = smov (!%p189_p10), 24   ;;  %s1481_s27 = smov (!%p189_p10), 8  }
  0x17   : > { %s1482_s30 = smov (!%p189_p10), 32   ;;  %s1483_s5 = smov (!%p189_p10), 4  }
  0x18   : > { %s1585_s8 = scalar_select %p230_p12, %s1465_s19, 1  ;;  %vm558_vm0 = vcmask 1042432   ;;  %vm559_vm1 = vcmask 1046532   ;;  %vm285_vm3 = vsmask.f32 3328  ;;  %vm849_vm6 = vcmask 31744  }
  0x19   : > { %vm1594_vm2 = vmor %vm558_vm0, %vm559_vm1  ;;  %vm286_vm4 = vsmask.f32 7440  ;;  %s1484_s6 = smov 16   ;;  %vm874_vm7 = vcmask 64512   ;;  %vm891_vm8 = vcmask 97280   ;;  %vm908_vm9 = vcmask 130048  }
  0x1a   : > { %s1303_s10 = smul.u32 216, %s1585_s8  ;;  %vm1642_vm5 = vmor %vm285_vm3, %vm286_vm4  ;;  %vm925_vm10 = vcmask 162816   ;;  %vm942_vm11 = vcmask 195584   ;;  %vm959_vm12 = vcmask 228352   ;;  %vm976_vm13 = vcmask 261120  }
  0x1b   : > { %vm994_vm14 = vcmask 293888  }
  0x1c   : > { %s234_s13 = scalar_lea.vmem %s2104_s0, %s1303_s10  ;;  %s1486_s10 = smov 20  }
  0x1d   : > { %s1592_s14 = scalar_lea.vmem %s234_s13, %s1292_s9  ;;  %s1485_s9 = smov 28  }
  0x1e   : > { %v1599_v1 = vld [vmem:[%s1592_s14 + $0x60] sm:$0xff]  ;;  %v276_v2 = vld [vmem:[%s1592_s14 + $0x54] sm:$0xf]  ;;  %v277_v3 = vld [vmem:[%s1592_s14 + $0x58] sm:$0xf]  ;;  %s1288_s13 = sshll.u32 %s1465_s19, 1 }
  0x1f   : > { %v278_v4 = vld [vmem:[%s1592_s14 + $0x5c] sm:$0x1]  ;;  %v1243_v5 = vrot.slane %v276_v2, 9  ;;  %v612_v6 = vrot.slane %v277_v3, 5  ;;  %v1605_v7 = vld [vmem:[%s1592_s14 + $0x6c] sm:$0xf]  ;;  %752 = vrot.lane.b32.xlu1 %v1599_v1, %s1479_s23 }
  0x20   : > { %v615_v8 = vrot.slane %v278_v4, 5  ;;  %v1610_v9 = vld [vmem:[%s1592_s14 + $0x70] sm:$0xf]  ;;  %v1613_v10 = vld [vmem:[%s1592_s14 + $0x74] sm:$0x1]  ;;  %v1245_v11 = vrot.slane %v1605_v7, 9 }
  0x21   : > { %v613_v12 = vsel %vm1594_vm2, %v1243_v5, %v612_v6  ;;  %v614_v13 = vrot.slane %v612_v6, 4  ;;  %v626_v14 = vrot.slane %v1610_v9, 5  ;;  %v629_v15 = vrot.slane %v1613_v10, 5  ;;  %v1302_v20 = vld [vmem:[%s1592_s14 + $0x6c] sm:$0xff]  ;;  %v1626_v25 = vld [vmem:[%s1592_s14 + $0x60] sm:$0xf] }
  0x22   : > { %v709_v16 = vunpack.c.l.b16 %v613_v12  ;;  %v457_v17 = vshrl.u32 %v276_v2, 16  ;;  %v460_v18 = vshll.u32 %v276_v2, 16  ;;  %v466_v19 = vshll.u32 %v277_v3, 16  ;;  %v1629_v30 = vld [vmem:[%s1592_s14 + $0x64] sm:$0xf]  ;;  %809 = vrot.lane.b32.xlu2 %v1302_v20, %s1480_s24 }
  0x23   : > { %v616_v21 = vsel %vm1594_vm2, %v614_v13, %v615_v8  ;;  %v627_v22 = vsel %vm1594_vm2, %v1245_v11, %v626_v14  ;;  %v628_v23 = vrot.slane %v626_v14, 4  ;;  %v470_v24 = vshrl.u32 %v277_v3, 16  ;;  %v1637_v38 = vld [vmem:[%s1592_s14 + $0x68] sm:$0x1]  ;;  %v1666_v8 = vld [vmem:[%s1592_s14 + $0x4c] sm:$0xf] }
  0x24   : > { %v710_v26 = vunpack.c.l.b16 %v616_v21  ;;  %v830_v27 = vunpack.c.l.b16 %v627_v22  ;;  %v459_v28 = vrot.slane %v457_v17, 4  ;;  %v462_v29 = vrot.slane %v460_v18, 5  ;;  %v1660_v61 = vld [vmem:[%s1592_s14 + $0x48] sm:$0xf]  ;;  %v1671_v14 = vld [vmem:[%s1592_s14 + $0x50] sm:$0x1] }
  0x25   : > { %v630_v31 = vsel %vm1594_vm2, %v628_v23, %v629_v15  ;;  %v468_v32 = vrot.slane %v466_v19, 5  ;;  %v472_v33 = vrot.slane %v470_v24, 4  ;;  %v476_v34 = vshll.u32 %v278_v4, 16 }
  0x26   : > { %v1634_v35 = vpack.c.b16 %v710_v26, %v709_v16  ;;  %v831_v36 = vunpack.c.l.b16 %v630_v31  ;;  %v463_v37 = vor.u32 %v462_v29, %v459_v28  ;;  %v481_v39 = vshrl.u32 %v1626_v25, 16 }
  0x27   : > { %v473_v41 = vor.u32 %v472_v33, %v468_v32  ;;  %v478_v42 = vrot.slane %v476_v34, 5  ;;  %v484_v43 = vshll.u32 %v1626_v25, 16  ;;  %v490_v44 = vshll.u32 %v1629_v30, 16 }
  0x28   : > { %733 = vrot.lane.b32.xlu0 %v1634_v35, %s1481_s27  ;;  %v832_v45 = vpack.c.b16 %v831_v36, %v830_v27  ;;  %v464_v46 = vrot.slane %v463_v37, 4  ;;  %v483_v47 = vrot.slane %v481_v39, 4  ;;  %v494_v48 = vshrl.u32 %v1629_v30, 16  ;;  %v1694_v37 = vld [vmem:[%s1592_s14 + $0x40] sm:$0xf] }
  0x29   : > { %v474_v49 = vrot.slane %v473_v41, 4  ;;  %v486_v50 = vrot.slane %v484_v43, 5  ;;  %v492_v51 = vrot.slane %v490_v44, 5  ;;  %v500_v52 = vshll.u32 %v1637_v38, 16 }
  0x2a   : > { %847 = vrot.lane.b32.xlu1 %v832_v45, %s1482_s30  ;;  %v469_v53 = vsel %vm1642_vm5, %v464_v46, %v468_v32  ;;  %v496_v54 = vrot.slane %v494_v48, 4  ;;  %v505_v55 = vshrl.u32 %v1605_v7, 16  ;;  %v508_v56 = vshll.u32 %v1605_v7, 16  ;;  %v1689_v32 = vld [vmem:[%s1592_s14 + $0x3c] sm:$0xf] }
  0x2b   : > { %v479_v57 = vsel %vm1642_vm5, %v474_v49, %v478_v42  ;;  %v669_v58 = vunpack.c.l.b16 %v469_v53  ;;  %v487_v59 = vor.u32 %v486_v50, %v483_v47  ;;  %v502_v60 = vrot.slane %v500_v52, 5  ;;  %v1706_v45 = vld [vmem:[%s1592_s14 + $0x44] sm:$0x1] }
  0x2c   : > { %v670_v62 = vunpack.c.l.b16 %v479_v57  ;;  %v497_v63 = vor.u32 %v496_v54, %v492_v51  ;;  %v507_v2 = vrot.slane %v505_v55, 4  ;;  %v510_v3 = vrot.slane %v508_v56, 5 }
  0x2d   : > { %v488_v4 = vrot.slane %v487_v59, 4  ;;  %v514_v5 = vshll.u32 %v1610_v9, 16  ;;  %v518_v6 = vshrl.u32 %v1610_v9, 16  ;;  %v524_v7 = vshll.u32 %v1613_v10, 16 }
  0x2e   : > { %v1668_v11 = vpack.c.b16 %v670_v62, %v669_v58  ;;  %v498_v12 = vrot.slane %v497_v63, 4  ;;  %v511_v13 = vor.u32 %v510_v3, %v507_v2  ;;  %v1242_v15 = vrot.slane %v1660_v61, 9  ;;  %v1716_v58 = vld [vmem:[%s1592_s14 + $0x54] sm:$0xff] }
  0x2f   : > { %v493_v16 = vsel %vm1642_vm5, %v488_v4, %v492_v51  ;;  %v516_v17 = vrot.slane %v514_v5, 5  ;;  %v520_v18 = vrot.slane %v518_v6, 4  ;;  %v526_v19 = vrot.slane %v524_v7, 5 }
  0x30   : > { %693 = vrot.lane.b32.xlu0 %v1668_v11, %s1483_s5  ;;  %v503_v9 = vsel %vm1642_vm5, %v498_v12, %v502_v60  ;;  %v754_v10 = vunpack.c.l.b16 %v493_v16  ;;  %v512_v20 = vrot.slane %v511_v13, 4  ;;  %v605_v21 = vrot.slane %v1666_v8, 5 }
  0x31   : > { %v755_v22 = vunpack.c.l.b16 %v503_v9  ;;  %v521_v23 = vor.u32 %v520_v18, %v516_v17  ;;  %v608_v24 = vrot.slane %v1671_v14, 5  ;;  %v1244_v26 = vrot.slane %v1626_v25, 9 }
  0x32   : > { %v517_v27 = vsel %vm1642_vm5, %v512_v20, %v516_v17  ;;  %v606_v28 = vsel %vm1594_vm2, %v1242_v15, %v605_v21  ;;  %v607_v29 = vrot.slane %v605_v21, 4  ;;  %v619_v31 = vrot.slane %v1629_v30, 5 }
  0x33   : > { %v1691_v33 = vpack.c.b16 %v755_v22, %v754_v10  ;;  %v522_v34 = vrot.slane %v521_v23, 4  ;;  %v811_v36 = vunpack.c.l.b16 %v517_v27  ;;  %v622_v42 = vrot.slane %v1637_v38, 5 }
  0x34   : > { %v609_v25 = vsel %vm1594_vm2, %v607_v29, %v608_v24  ;;  %v620_v39 = vsel %vm1594_vm2, %v1244_v26, %v619_v31  ;;  %v621_v41 = vrot.slane %v619_v31, 4  ;;  %v707_v43 = vunpack.c.l.b16 %v606_v28 }
  0x35   : > { %771 = vrot.lane.b32.xlu1 %v1691_v33, %s1484_s6  ;;  %v527_v30 = vsel %vm1642_vm5, %v522_v34, %v526_v19  ;;  %v773_v44 = vunpack.c.l.b16 %v620_v39  ;;  %v409_v46 = vshrl.u32 %v1689_v32, 16  ;;  %v412_v38 = vshll.u32 %v1689_v32, 16  ;;  %v267_v34 = vld [vmem:[%s1592_s14 + $0x30] sm:$0xf] }
  0x36   : > { %v812_v47 = vunpack.c.l.b16 %v527_v30  ;;  %v623_v48 = vsel %vm1594_vm2, %v621_v41, %v622_v42  ;;  %v418_v49 = vshll.u32 %v1694_v37, 16  ;;  %v708_v50 = vunpack.c.l.b16 %v609_v25 }
  0x37   : > { %v774_v51 = vunpack.c.l.b16 %v623_v48  ;;  %v411_v52 = vrot.slane %v409_v46, 4  ;;  %v422_v53 = vshrl.u32 %v1694_v37, 16  ;;  %v414_v55 = vrot.slane %v412_v38, 5 }
  0x38   : > { %v813_v54 = vpack.c.b16 %v812_v47, %v811_v36  ;;  %v420_v56 = vrot.slane %v418_v49, 5  ;;  %v428_v57 = vshll.u32 %v1706_v45, 16  ;;  %v433_v62 = vshrl.u32 %v1660_v61, 16  ;;  %v268_v36 = vld [vmem:[%s1592_s14 + $0x34] sm:$0xf] }
  0x39   : > { %v775_v59 = vpack.c.b16 %v774_v51, %v773_v44  ;;  %v424_v60 = vrot.slane %v422_v53, 4  ;;  %v436_v63 = vshll.u32 %v1660_v61, 16  ;;  %v415_v2 = vor.u32 %v414_v55, %v411_v52 }
  0x3a   : > { %828 = vrot.lane.b32.xlu0 %v813_v54, %s1485_s9  ;;  %v442_v3 = vshll.u32 %v1666_v8, 16  ;;  %v446_v4 = vshrl.u32 %v1666_v8, 16  ;;  %v435_v6 = vrot.slane %v433_v62, 4  ;;  %v452_v12 = vshll.u32 %v1671_v14, 16 }
  0x3b   : > { %790 = vrot.lane.b32.xlu2 %v775_v59, %s1486_s10  ;;  %v425_v5 = vor.u32 %v424_v60, %v420_v56  ;;  %v438_v7 = vrot.slane %v436_v63, 5  ;;  %v1725_v16 = vpack.c.b16 %v708_v50, %v707_v43  ;;  %v430_v61 = vrot.slane %v428_v57, 5 }
  0x3c   : > { %v444_v13 = vrot.slane %v442_v3, 5  ;;  %v448_v15 = vrot.slane %v446_v4, 4  ;;  %v416_v18 = vrot.slane %v415_v2, 4  ;;  %v454_v9 = vrot.slane %v452_v12, 5 }
  0x3d   : > { %750 = vrot.lane.b32.xlu1 %v1716_v58, %s1479_s23  ;;  %v439_v17 = vor.u32 %v438_v7, %v435_v6  ;;  %v426_v19 = vrot.slane %v425_v5, 4  ;;  %v598_v25 = vrot.slane %v1694_v37, 5  ;;  %v388_v39 = vshll.u32 %v267_v34, 16  ;;  %v269_v37 = vld [vmem:[%s1592_s14 + $0x38] sm:$0x1] }
  0x3e   : > { %v449_v8 = vor.u32 %v448_v15, %v444_v13  ;;  %v421_v21 = vsel %vm1642_vm5, %v416_v18, %v420_v56  ;;  %v394_v41 = vshll.u32 %v268_v36, 16  ;;  %v398_v42 = vshrl.u32 %v268_v36, 16 }
  0x3f   : > { %v440_v10 = vrot.slane %v439_v17, 4  ;;  %v431_v22 = vsel %vm1642_vm5, %v426_v19, %v430_v61  ;;  %v665_v27 = vunpack.c.l.b16 %v421_v21  ;;  %v1241_v30 = vrot.slane %v1689_v32, 9  ;;  %v1767_v32 = vld [vmem:[%s1592_s14 + $0x48] sm:$0xff]  ;;  %v264_v61 = vld [vmem:[%s1592_s14 + $0x24] sm:$0xf] }
  0x40   : > { %v450_v20 = vrot.slane %v449_v8, 4  ;;  %v666_v28 = vunpack.c.l.b16 %v431_v22  ;;  %v600_v43 = vrot.slane %v598_v25, 4  ;;  %v601_v44 = vrot.slane %v1706_v45, 5  ;;  %v265_v17 = vld [vmem:[%s1592_s14 + $0x28] sm:$0xf] }
  0x41   : > { %v445_v14 = vsel %vm1642_vm5, %v440_v10, %v444_v13  ;;  %v591_v46 = vrot.slane %v268_v36, 5  ;;  %v390_v48 = vrot.slane %v388_v39, 5  ;;  %v396_v38 = vrot.slane %v394_v41, 5  ;;  %v266_v21 = vld [vmem:[%s1592_s14 + $0x2c] sm:$0x1]  ;;  %v1819_v39 = vld [vmem:[%s1592_s14 + $0x3c] sm:$0xff] }
  0x42   : > { %731 = vrot.lane.b32.xlu0 %v1725_v16, %s1481_s27  ;;  %v455_v23 = vsel %vm1642_vm5, %v450_v20, %v454_v9  ;;  %v667_v24 = vunpack.c.l.b16 %v445_v14  ;;  %v1745_v31 = vpack.c.b16 %v666_v28, %v665_v27  ;;  %v400_v49 = vrot.slane %v398_v42, 4  ;;  %v1806_v20 = vld [vmem:[%s1592_s14 + $0x18] sm:$0xf]  ;;  %v1809_v14 = vld [vmem:[%s1592_s14 + $0x1c] sm:$0xf] }
  0x43   : > { %v668_v26 = vunpack.c.l.b16 %v455_v23  ;;  %v599_v50 = vsel %vm1594_vm2, %v1241_v30, %v598_v25  ;;  %v602_v51 = vsel %vm1594_vm2, %v600_v43, %v601_v44  ;;  %v404_v45 = vshll.u32 %v269_v37, 16 }
  0x44   : > { %v1240_v52 = vrot.slane %v267_v34, 9  ;;  %v593_v53 = vrot.slane %v591_v46, 4  ;;  %v594_v54 = vrot.slane %v269_v37, 5  ;;  %v401_v56 = vor.u32 %v400_v49, %v396_v38 }
  0x45   : > { %807 = vrot.lane.b32.xlu1 %v1599_v1, %s1480_s24  ;;  %v1741_v29 = vpack.c.b16 %v668_v26, %v667_v24  ;;  %v385_v1 = vshrl.u32 %v267_v34, 16  ;;  %v705_v57 = vunpack.c.l.b16 %v599_v50  ;;  %v406_v3 = vrot.slane %v404_v45, 5 }
  0x46   : > { %v592_v60 = vsel %vm1594_vm2, %v1240_v52, %v591_v46  ;;  %v595_v62 = vsel %vm1594_vm2, %v593_v53, %v594_v54  ;;  %v402_v2 = vrot.slane %v401_v56, 4  ;;  %v361_v18 = vshrl.u32 %v264_v61, 16  ;;  %v1831_v52 = vld [vmem:[%s1592_s14 + $0x30] sm:$0xff] }
  0x47   : > { %691 = vrot.lane.b32.xlu2 %v1741_v29, %s1483_s5  ;;  %v387_v47 = vrot.slane %v385_v1, 4  ;;  %v704_v5 = vunpack.c.l.b16 %v595_v62  ;;  %v364_v19 = vshll.u32 %v264_v61, 16  ;;  %v370_v8 = vshll.u32 %v265_v17, 16 }
  0x48   : > { %v407_v7 = vsel %vm1642_vm5, %v402_v2, %v406_v3  ;;  %v374_v9 = vshrl.u32 %v265_v17, 16  ;;  %v584_v10 = vrot.slane %v265_v17, 5  ;;  %v363_v22 = vrot.slane %v361_v18, 4 }
  0x49   : > { %v391_v55 = vor.u32 %v390_v48, %v387_v47  ;;  %v366_v23 = vrot.slane %v364_v19, 5  ;;  %v372_v24 = vrot.slane %v370_v8, 5  ;;  %v1239_v27 = vrot.slane %v264_v61, 9  ;;  %v259_v61 = vld [vmem:[%s1592_s14 + $0x10] sm:$0xf] }
  0x4a   : > { %788 = vrot.lane.b32.xlu0 %v1634_v35, %s1486_s10  ;;  %v376_v26 = vrot.slane %v374_v9, 4  ;;  %v337_v28 = vshrl.u32 %v1806_v20, 16  ;;  %v340_v34 = vshll.u32 %v1806_v20, 16  ;;  %v350_v36 = vshrl.u32 %v1809_v14, 16 }
  0x4b   : > { %v392_v63 = vrot.slane %v391_v55, 4  ;;  %v586_v25 = vrot.slane %v584_v10, 4  ;;  %v587_v1 = vrot.slane %v266_v21, 5  ;;  %v367_v41 = vor.u32 %v366_v23, %v363_v22 }
  0x4c   : > { %v377_v42 = vor.u32 %v376_v26, %v372_v24  ;;  %v380_v30 = vshll.u32 %v266_v21, 16  ;;  %v585_v43 = vsel %vm1594_vm2, %v1239_v27, %v584_v10  ;;  %v339_v44 = vrot.slane %v337_v28, 4 }
  0x4d   : > { %689 = vrot.lane.b32.xlu1 %v1745_v31, %s1483_s5  ;;  %v397_v6 = vsel %vm1642_vm5, %v392_v63, %v396_v38  ;;  %v342_v46 = vrot.slane %v340_v34, 5  ;;  %v352_v47 = vrot.slane %v350_v36, 4  ;;  %v588_v48 = vsel %vm1594_vm2, %v586_v25, %v587_v1  ;;  %v263_v38 = vld [vmem:[%s1592_s14 + $0x20] sm:$0x1] }
  0x4e   : > { %v663_v13 = vunpack.c.l.b16 %v397_v6  ;;  %v368_v49 = vrot.slane %v367_v41, 4  ;;  %v378_v50 = vrot.slane %v377_v42, 4  ;;  %v701_v45 = vunpack.c.l.b16 %v585_v43 }
  0x4f   : > { %769 = vrot.lane.b32.xlu2 %v1668_v11, %s1484_s6  ;;  %v343_v53 = vor.u32 %v342_v46, %v339_v44  ;;  %v356_v55 = vshll.u32 %v263_v38, 16  ;;  %v577_v17 = vrot.slane %v1809_v14, 5  ;;  %v322_v9 = vshll.u32 %v259_v61, 16 }
  0x50   : > { %v373_v56 = vsel %vm1642_vm5, %v368_v49, %v372_v24  ;;  %v326_v10 = vshrl.u32 %v259_v61, 16  ;;  %v1238_v21 = vrot.slane %v1806_v20, 9  ;;  %v580_v23 = vrot.slane %v263_v38, 5  ;;  %v1881_v20 = vld [vmem:[%s1592_s14 + $0x24] sm:$0xff] }
  0x51   : > { %v661_v63 = vunpack.c.l.b16 %v373_v56  ;;  %v579_v22 = vrot.slane %v577_v17, 4  ;;  %v570_v26 = vrot.slane %v259_v61, 5  ;;  %v324_v28 = vrot.slane %v322_v9, 5  ;;  %v256_v61 = vld [vmem:[%s1592_s14 + $0x4] sm:$0xf] }
  0x52   : > { %845 = vrot.lane.b32.xlu0 %v775_v59, %s1482_s30  ;;  %v706_v59 = vunpack.c.l.b16 %v602_v51  ;;  %v382_v51 = vrot.slane %v380_v30, 5  ;;  %v328_v34 = vrot.slane %v326_v10, 4  ;;  %v578_v36 = vsel %vm1594_vm2, %v1238_v21, %v577_v17 }
  0x53   : > { %v581_v25 = vsel %vm1594_vm2, %v579_v22, %v580_v23  ;;  %v572_v41 = vrot.slane %v570_v26, 4  ;;  %v699_v46 = vunpack.c.l.b16 %v578_v36  ;;  %v298_v10 = vshll.u32 %v256_v61, 16 }
  0x54   : > { %v1777_v4 = vpack.c.b16 %v706_v59, %v705_v57  ;;  %v383_v57 = vsel %vm1642_vm5, %v378_v50, %v382_v51  ;;  %v329_v43 = vor.u32 %v328_v34, %v324_v28  ;;  %v302_v21 = vshrl.u32 %v256_v61, 16 }
  0x55   : > { %767 = vrot.lane.b32.xlu1 %v1741_v29, %s1484_s6  ;;  %v662_v2 = vunpack.c.l.b16 %v383_v57  ;;  %v300_v34 = vrot.slane %v298_v10, 5 }
  0x56   : > { %v330_v50 = vrot.slane %v329_v43, 4 }
  0x57   : > { %826 = vrot.lane.b32.xlu2 %v1691_v33, %s1485_s9  ;;  %v703_v33 = vunpack.c.l.b16 %v592_v60  ;;  %v344_v60 = vrot.slane %v343_v53, 4 }
  0x59   : > { %v1787_v12 = vpack.c.b16 %v704_v5, %v703_v33  ;;  %v1851_v5 = vpack.c.b16 %v662_v2, %v661_v63 }
  0x5a   : > { %748 = vrot.lane.b32.xlu0 %v1767_v32, %s1479_s23 }
  0x5d   : > { %824 = vrot.lane.b32.xlu1 %v1668_v11, %s1485_s9  ;;  %v664_v11 = vunpack.c.l.b16 %v407_v7 }
  0x5f   : > { %729 = vrot.lane.b32.xlu2 %v1777_v4, %s1481_s27  ;;  %v1793_v15 = vpack.c.b16 %v664_v11, %v663_v13  ;;  %v258_v11 = vld [vmem:[%s1592_s14 + $0xc] sm:$0xf] }
  0x60   : > { %v313_v19 = vshrl.u32 %v258_v11, 16  ;;  %v316_v8 = vshll.u32 %v258_v11, 16 }
  0x62   : > { %805 = vrot.lane.b32.xlu0 %v1716_v58, %s1480_s24  ;;  %v318_v24 = vrot.slane %v316_v8, 5 }
  0x65   : > { %727 = vrot.lane.b32.xlu1 %v1787_v12, %s1481_s27 }
  0x67   : > { %786 = vrot.lane.b32.xlu2 %v1725_v16, %s1486_s10 }
  0x6a   : > { %687 = vrot.lane.b32.xlu0 %v1793_v15, %s1483_s5 }
  0x6d   : > { %784 = vrot.lane.b32.xlu1 %v1777_v4, %s1486_s10 }
  0x6f   : > { %843 = vrot.lane.b32.xlu2 %v1634_v35, %s1482_s30  ;;  %v346_v35 = vshll.u32 %v1809_v14, 16  ;;  %v315_v14 = vrot.slane %v313_v19, 4 }
  0x71   : > { %v348_v37 = vrot.slane %v346_v35, 5  ;;  %v260_v35 = vld [vmem:[%s1592_s14 + $0x14] sm:$0x1]  ;;  %v319_v1 = vor.u32 %v318_v24, %v315_v14 }
  0x72   : > { %765 = vrot.lane.b32.xlu0 %v1745_v31, %s1484_s6  ;;  %v573_v42 = vrot.slane %v260_v35, 5  ;;  %v332_v44 = vshll.u32 %v260_v35, 16  ;;  %v304_v35 = vrot.slane %v302_v21, 4 }
  0x73   : > { %v353_v54 = vor.u32 %v352_v47, %v348_v37  ;;  %v349_v3 = vsel %vm1642_vm5, %v344_v60, %v348_v37  ;;  %v700_v37 = vunpack.c.l.b16 %v581_v25  ;;  %v320_v49 = vrot.slane %v319_v1, 4 }
  0x74   : > { %v659_v6 = vunpack.c.l.b16 %v349_v3  ;;  %v574_v38 = vsel %vm1594_vm2, %v572_v41, %v573_v42  ;;  %v334_v51 = vrot.slane %v332_v44, 5  ;;  %v1934_v41 = vld [vmem:[%s1592_s14 + $0x18] sm:$0xff]  ;;  %v305_v43 = vor.u32 %v304_v35, %v300_v34 }
  0x75   : > { %841 = vrot.lane.b32.xlu1 %v1725_v16, %s1482_s30  ;;  %v702_v16 = vunpack.c.l.b16 %v588_v48  ;;  %v354_v62 = vrot.slane %v353_v54, 4  ;;  %v698_v53 = vunpack.c.l.b16 %v574_v38  ;;  %v325_v54 = vsel %vm1642_vm5, %v320_v49, %v324_v28 }
  0x76   : > { %v657_v60 = vunpack.c.l.b16 %v325_v54  ;;  %v306_v38 = vrot.slane %v305_v43, 4 }
  0x77   : > { %746 = vrot.lane.b32.xlu2 %v1819_v39, %s1479_s23  ;;  %v1841_v59 = vpack.c.b16 %v702_v16, %v701_v45  ;;  %v1891_v45 = vpack.c.b16 %v700_v37, %v699_v46 }
  0x7a   : > { %822 = vrot.lane.b32.xlu0 %v1741_v29, %s1485_s9  ;;  %v358_v29 = vrot.slane %v356_v55, 5  ;;  %v335_v55 = vsel %vm1642_vm5, %v330_v50, %v334_v51  ;;  %v1948_v50 = vld [vmem:[%s1592_s14 + $0xc] sm:$0xff] }
  0x7c   : > { %v359_v33 = vsel %vm1642_vm5, %v354_v62, %v358_v29  ;;  %v1866_v18 = vpop.permute.xlu2 %809  ;;  %v658_v62 = vunpack.c.l.b16 %v335_v55 }
  0x7d   : > { %744 = vrot.lane.b32.xlu1 %v1831_v52, %s1479_s23  ;;  %v660_v7 = vunpack.c.l.b16 %v359_v33 }
  0x7e   : > { %v1911_v3 = vpack.c.b16 %v658_v62, %v657_v60 }
  0x7f   : > { %803 = vrot.lane.b32.xlu2 %v1767_v32, %s1480_s24  ;;  %v1857_v13 = vpack.c.b16 %v660_v7, %v659_v6 }
  0x82   : > { %725 = vrot.lane.b32.xlu0 %v1841_v59, %s1481_s27 }
  0x85   : > { %801 = vrot.lane.b32.xlu1 %v1819_v39, %s1480_s24 }
  0x87   : > { %685 = vrot.lane.b32.xlu2 %v1851_v5, %s1483_s5 }
  0x8a   : > { %782 = vrot.lane.b32.xlu0 %v1787_v12, %s1486_s10 }
  0x8d   : > { %683 = vrot.lane.b32.xlu1 %v1857_v13, %s1483_s5 }
  0x8f   : > { %763 = vrot.lane.b32.xlu2 %v1793_v15, %s1484_s6 }
  0x91   : > { %v753_v27 = vpop.permute.xlu1 %752 }
  0x92   : > { %839 = vrot.lane.b32.xlu0 %v1777_v4, %s1482_s30  ;;  %v1237_v4 = vrot.slane %v258_v11, 9  ;;  %v255_v11 = vld [vmem:[%s1592_s14] sm:$0xf] }
  0x93   : > { %v289_v17 = vshrl.u32 %v255_v11, 16  ;;  %v292_v9 = vshll.u32 %v255_v11, 16  ;;  %v1236_v25 = vrot.slane %v255_v11, 9 }
  0x94   : > { %v571_v48 = vsel %vm1594_vm2, %v1237_v4, %v570_v26  ;;  %v563_v26 = vrot.slane %v256_v61, 5 }
  0x95   : > { %761 = vrot.lane.b32.xlu1 %v1851_v5, %s1484_s6  ;;  %v791_v30 = vpop.permute.xlu2 %790  ;;  %v697_v16 = vunpack.c.l.b16 %v571_v48  ;;  %v294_v28 = vrot.slane %v292_v9, 5 }
  0x96   : > { %v565_v1 = vrot.slane %v563_v26, 4 }
  0x97   : > { %820 = vrot.lane.b32.xlu2 %v1745_v31, %s1485_s9  ;;  %v1901_v56 = vpack.c.b16 %v698_v53, %v697_v16 }
  0x9a   : > { %742 = vrot.lane.b32.xlu0 %v1881_v20, %s1479_s23  ;;  %v734_v47 = vpop.permute.xlu0 %733 }
  0x9c   : > { %v848_v31 = vpop.permute.xlu1 %847 }
  0x9d   : > { %818 = vrot.lane.b32.xlu1 %v1793_v15, %s1485_s9 }
  0x9f   : > { %723 = vrot.lane.b32.xlu2 %v1891_v45, %s1481_s27 }
  0xa1   : > { %v692_v57 = vpop.permute.xlu2 %691 }
  0xa2   : > { %799 = vrot.lane.b32.xlu0 %v1831_v52, %s1480_s24  ;;  %v694_v15 = vpop.permute.xlu0 %693 }
  0xa3   : > { %v873_v29 = vsel %vm849_vm6, %v1716_v58, %v694_v15 }
  0xa4   : > { %v890_v63 = vsel %vm874_vm7, %v873_v29, %v734_v47  ;;  %v564_v47 = vsel %vm1594_vm2, %v1236_v25, %v563_v26 }
  0xa5   : > { %v907_v2 = vsel %vm891_vm8, %v890_v63, %v753_v27  ;;  %721 = vrot.lane.b32.xlu1 %v1901_v56, %s1481_s27  ;;  %v291_v27 = vrot.slane %v289_v17, 4 }
  0xa7   : > { %v772_v33 = vpop.permute.xlu1 %771  ;;  %780 = vrot.lane.b32.xlu2 %v1841_v59, %s1486_s10 }
  0xa8   : > { %v924_v6 = vsel %vm908_vm9, %v907_v2, %v772_v33 }
  0xa9   : > { %v941_v58 = vsel %vm925_vm10, %v924_v6, %v791_v30  ;;  %v770_v7 = vpop.permute.xlu2 %769  ;;  %v295_v30 = vor.u32 %v294_v28, %v291_v27 }
  0xaa   : > { %681 = vrot.lane.b32.xlu0 %v1911_v3, %s1483_s5  ;;  %v958_v19 = vsel %vm942_vm11, %v941_v58, %v1866_v18  ;;  %v257_v18 = vld [vmem:[%s1592_s14 + $0x8] sm:$0x1] }
  0xab   : > { %v566_v4 = vrot.slane %v257_v18, 5  ;;  %v308_v44 = vshll.u32 %v257_v18, 16 }
  0xac   : > { %v829_v8 = vpop.permute.xlu0 %828 }
  0xad   : > { %v975_v22 = vsel %vm959_vm12, %v958_v19, %v829_v8  ;;  %778 = vrot.lane.b32.xlu1 %v1891_v45, %s1486_s10  ;;  %v567_v48 = vsel %vm1594_vm2, %v565_v1, %v566_v4  ;;  %v310_v49 = vrot.slane %v308_v44, 5 }
  0xae   : > { %v992_v23 = vsel %vm976_vm13, %v975_v22, %v848_v31  ;;  %v695_v31 = vunpack.c.l.b16 %v564_v47  ;;  %v696_v16 = vunpack.c.l.b16 %v567_v48 }
  0xaf   : > { %v1012_v14 = vsel %vm994_vm14, %v992_v23, 0  ;;  %v751_v24 = vpop.permute.xlu1 %750  ;;  %837 = vrot.lane.b32.xlu2 %v1787_v12, %s1482_s30  ;;  %v870_v12 = vsel %vm849_vm6, %v1767_v32, %v692_v57  ;;  %v296_v32 = vrot.slane %v295_v30, 4  ;;  %v311_v54 = vsel %vm1642_vm5, %v306_v38, %v310_v49 }
  0xb0   : > { %1014 = vmatpush.bf16.xpose.msra.mxu0 %v1012_v14  ;;  %v711_v15 = vpack.c.b16 %v696_v16, %v695_v31  ;;  %v656_v62 = vunpack.c.l.b16 %v311_v54 }
  0xb1   : > { %v827_v36 = vpop.permute.xlu2 %826  ;;  %v301_v0 = vsel %vm1642_vm5, %v296_v32, %v300_v34 }
  0xb2   : > { %759 = vrot.lane.b32.xlu0 %v1857_v13, %s1484_s6 }
  0xb4   : > { %v732_v42 = vpop.permute.xlu0 %731 }
  0xb5   : > { %835 = vrot.lane.b32.xlu1 %v1841_v59, %s1482_s30  ;;  %v888_v46 = vsel %vm874_vm7, %v870_v12, %v732_v42 }
  0xb6   : > { %v905_v59 = vsel %vm891_vm8, %v888_v46, %v751_v24 }
  0xb7   : > { %v808_v37 = vpop.permute.xlu1 %807  ;;  %740 = vrot.lane.b32.xlu2 %v1934_v41, %s1479_s23  ;;  %v922_v55 = vsel %vm908_vm9, %v905_v59, %v770_v7 }
  0xb9   : > { %v730_v51 = vpop.permute.xlu2 %729 }
  0xba   : > { %816 = vrot.lane.b32.xlu0 %v1851_v5, %s1485_s9  ;;  %v655_v5 = vunpack.c.l.b16 %v301_v0 }
  0xbc   : > { %v789_v53 = vpop.permute.xlu0 %788  ;;  %v671_v40 = vpack.c.b16 %v656_v62, %v655_v5 }
  0xbd   : > { %738 = vrot.lane.b32.xlu1 %v1948_v50, %s1479_s23  ;;  %v939_v57 = vsel %vm925_vm10, %v922_v55, %v789_v53  ;;  %s207_s23 = sand.u32 1, %s1453_s16  }
  0xbe   : > { %v956_v29 = vsel %vm942_vm11, %v939_v57, %v808_v37  ;;  %s1037_s11 = scalar_lea.sflag [#allocation3], %s207_s23 }
  0xbf   : > { %v690_v60 = vpop.permute.xlu1 %689  ;;  %797 = vrot.lane.b32.xlu2 %v1881_v20, %s1480_s24  ;;  %v973_v2 = vsel %vm959_vm12, %v956_v29, %v827_v36 }
  0xc0   : > { %v867_v11 = vsel %vm849_vm6, %v1819_v39, %v690_v60 }
  0xc1   : > { %v787_v63 = vpop.permute.xlu2 %786  ;;  %v886_v17 = vsel %vm874_vm7, %v867_v11, %v730_v51 }
  0xc2   : > { %719 = vrot.lane.b32.xlu0 %v711_v15, %s1481_s27  ;;  %s1227_s27 = sshll.u32 %s207_s23, 3 }
  0xc4   : > { %v846_v33 = vpop.permute.xlu0 %845 }
  0xc5   : > { %v990_v6 = vsel %vm976_vm13, %v973_v2, %v846_v33  ;;  %795 = vrot.lane.b32.xlu1 %v1934_v41, %s1480_s24 }
  0xc6   : > { %v1010_v58 = vsel %vm994_vm14, %v990_v6, 0 }
  0xc7   : > { %1015 = vmatpush.bf16.xpose.msra.mxu0 %v1010_v58  ;;  %v768_v7 = vpop.permute.xlu1 %767  ;;  %679 = vrot.lane.b32.xlu2 %v671_v40, %s1483_s5 }
  0xc9   : > { %v844_v61 = vpop.permute.xlu2 %843 }
  0xca   : > { %776 = vrot.lane.b32.xlu0 %v1901_v56, %s1486_s10 }
  0xcc   : > { %v749_v19 = vpop.permute.xlu0 %748 }
  0xcd   : > { %v903_v8 = vsel %vm891_vm8, %v886_v17, %v749_v19 }
  0xce   : > { %v920_v10 = vsel %vm908_vm9, %v903_v8, %v768_v7 }
  0xcf   : > { %v825_v9 = vpop.permute.xlu1 %824  ;;  %757 = vrot.lane.b32.xlu2 %v1911_v3, %s1484_s6  ;;  %v937_v39 = vsel %vm925_vm10, %v920_v10, %v787_v63 }
  0xd1   : > { %v747_v21 = vpop.permute.xlu2 %746 }
  0xd2   : > { %833 = vrot.lane.b32.xlu0 %v1891_v45, %s1482_s30 }
  0xd4   : > { %v806_v22 = vpop.permute.xlu0 %805 }
  0xd5   : > { %v954_v56 = vsel %vm942_vm11, %v937_v39, %v806_v22 }
  0xd6   : > { %v971_v23 = vsel %vm959_vm12, %v954_v56, %v825_v9 }
  0xd7   : > { %v988_v14 = vsel %vm976_vm13, %v971_v23, %v844_v61  ;;  %v728_v24 = vpop.permute.xlu1 %727  ;;  %814 = vrot.lane.b32.xlu2 %v1857_v13, %s1485_s9  ;;  %s209_s9 = scalar_lea.vmem [#allocation2], %s1227_s27 }
  0xd8   : > { %v1008_v3 = vsel %vm994_vm14, %v988_v14, 0  ;;  %s1067_s10 = sshll.u32 %s209_s9, 4  ;;  %s1068_s10 = int_to_ptr.vmem [resolvable:$true] %s1067_s10 }
  0xd9   : > { %1016 = vmatpush.bf16.xpose.msra.mxu0 %v1008_v3  ;;  %v804_v26 = vpop.permute.xlu2 %803 }
  0xdc   : > { %v688_v18 = vpop.permute.xlu0 %687 }
  0xdd   : > { %v864_v45 = vsel %vm849_vm6, %v1831_v52, %v688_v18 }
  0xde   : > { %v884_v34 = vsel %vm874_vm7, %v864_v45, %v728_v24 }
  0xdf   : > { %v785_v27 = vpop.permute.xlu1 %784  ;;  %v901_v36 = vsel %vm891_vm8, %v884_v34, %v747_v21 }
  0xe1   : > { %v686_v28 = vpop.permute.xlu2 %685 }
  0xe2   : > { %v861_v37 = vsel %vm849_vm6, %v1881_v20, %v686_v28 }
  0xe4   : > { %v766_v35 = vpop.permute.xlu0 %765 }
  0xe5   : > { %v918_v25 = vsel %vm908_vm9, %v901_v36, %v766_v35 }
  0xe6   : > { %v935_v13 = vsel %vm925_vm10, %v918_v25, %v785_v27  ;;  %v1293_v27 = vld [vmem:[%s1592_s14] sm:$0xff]  ;;  %s1063_s14 = sadd.s32 %s1461_s18, %s1288_s13 }
  0xe7   : > { %v842_v1 = vpop.permute.xlu1 %841  ;;  %v952_v12 = vsel %vm942_vm11, %v935_v13, %v804_v26  ;;  %s1289_s24 = sshll.u32 %s1063_s14, 3 }
  0xe8   : > { %s1065_s6 = scalar_lea.hbm %s2098_s2, %s1289_s24  ;;  %s1403_s24 = scalar_lea.hbm %s2098_s2, 32 }
  0xe9   : > { %v764_v4 = vpop.permute.xlu2 %763  ;;  %s1069_s0 = sshll.u32 %s1065_s6, 4  ;;  %s1070_s0 = int_to_ptr.hbm [resolvable:$true] %s1069_s0 }
  0xea   : > { %s1397_s19 = sshra.s32 %s1070_s0, 4  ;;  %s1398_s19 = int_to_ptr.hbm [resolvable:$true] %s1397_s19 }
  0xeb   : > { %s1399_s12 = scalar_lea.hbm %s1398_s19, 8  ;;  %p1404_p2 = scmp.lt.s32.totalorder %s1398_s19, %s2098_s2 }
  0xec   : > { %v823_v42 = vpop.permute.xlu0 %822  ;;  %p1400_p13 = scmp.ne.s32.totalorder %s1398_s19, %s1399_s12  ;;  %p1405_p4 = scmp.lt.s32.totalorder %s1403_s24, %s1399_s12 }
  0xed   : > { %v969_v30 = vsel %vm959_vm12, %v952_v12, %v823_v42 }
  0xee   : > { %v986_v52 = vsel %vm976_vm13, %v969_v30, %v842_v1  ;;  %p1401_p0 = pnand %p1400_p13, %p1563_p3  ;;  %p1406_p5 = por %p1405_p4, %p1404_p2 }
  0xef   : > { %v1006_v43 = vsel %vm994_vm14, %v986_v52, 0  ;;  %v745_v44 = vpop.permute.xlu1 %744 }
  0xf0   : > { %1017 = vmatpush.bf16.xpose.msra.mxu0 %v1006_v43  ;;  %p1402_p1 = pneg %p1401_p0 }
  0xf1   : > { %v821_v46 = vpop.permute.xlu2 %820 }
  0xf2   : > { %p1407_p6 = pnand %p1406_p5, %p1402_p1 }
  0xf4   : > { %v726_v47 = vpop.permute.xlu0 %725 }
  0xf5   : > { %v882_v48 = vsel %vm874_vm7, %v861_v37, %v726_v47  ;;  %v993_v47 = vld [vmem:[%s2097_s1] sm:$0xf] }
  0xf6   : > { %v899_v38 = vsel %vm891_vm8, %v882_v48, %v745_v44 }
  0xf7   : > { %v802_v32 = vpop.permute.xlu1 %801  ;;  %v916_v59 = vsel %vm908_vm9, %v899_v38, %v764_v4 }
  0xf9   : > { %v724_v49 = vpop.permute.xlu2 %723 }
  0xfc   : > { %v783_v51 = vpop.permute.xlu0 %782 }
  0xfd   : > { %v933_v31 = vsel %vm925_vm10, %v916_v59, %v783_v51 }
  0xfe   : > { %v950_v53 = vsel %vm942_vm11, %v933_v31, %v802_v32 }
  0xff   : > { %v684_v16 = vpop.permute.xlu1 %683  ;;  %v967_v0 = vsel %vm959_vm12, %v950_v53, %v821_v46 }
 0x100   : > { %v858_v60 = vsel %vm849_vm6, %v1934_v41, %v684_v16 }
 0x101   : > { %v781_v55 = vpop.permute.xlu2 %780  ;;  %v880_v5 = vsel %vm874_vm7, %v858_v60, %v724_v49 }
 0x104   : > { %v840_v54 = vpop.permute.xlu0 %839 }
 0x105   : > { %v984_v20 = vsel %vm976_vm13, %v967_v0, %v840_v54 }
 0x106   : > { %v1004_v57 = vsel %vm994_vm14, %v984_v20, 0 }
 0x107   : > { %1018 = vmatpush.bf16.xpose.msra.mxu0 %v1004_v57  ;;  %v762_v15 = vpop.permute.xlu1 %761 }
 0x109   : > { %v838_v40 = vpop.permute.xlu2 %837 }
 0x10c   : > { %v743_v62 = vpop.permute.xlu0 %742 }
 0x10d   : > { %v897_v29 = vsel %vm891_vm8, %v880_v5, %v743_v62 }
 0x10e   : > { %v914_v2 = vsel %vm908_vm9, %v897_v29, %v762_v15 }
 0x10f   : > { %v819_v63 = vpop.permute.xlu1 %818  ;;  %v931_v33 = vsel %vm925_vm10, %v914_v2, %v781_v55 }
 0x111   : > { %v741_v17 = vpop.permute.xlu2 %740 }
 0x114   : > { %v800_v6 = vpop.permute.xlu0 %799 }
 0x115   : > { %v948_v58 = vsel %vm942_vm11, %v931_v33, %v800_v6 }
 0x116   : > { %v965_v7 = vsel %vm959_vm12, %v948_v58, %v819_v63 }
 0x117   : > { %v982_v11 = vsel %vm976_vm13, %v965_v7, %v838_v40  ;;  %v722_v61 = vpop.permute.xlu1 %721 }
 0x118   : > { %v1002_v41 = vsel %vm994_vm14, %v982_v11, 0 }
 0x119   : > { %1019 = vmatpush.bf16.xpose.msra.mxu0 %v1002_v41  ;;  %v798_v21 = vpop.permute.xlu2 %797 }
 0x11c   : > { %v682_v19 = vpop.permute.xlu0 %681 }
 0x11d   : > { %v855_v8 = vsel %vm849_vm6, %v1948_v50, %v682_v19 }
 0x11e   : > { %v878_v10 = vsel %vm874_vm7, %v855_v8, %v722_v61 }
 0x11f   : > { %v779_v9 = vpop.permute.xlu1 %778  ;;  %v895_v22 = vsel %vm891_vm8, %v878_v10, %v741_v17 }
 0x121   : > { %v680_v18 = vpop.permute.xlu2 %679 }
 0x122   : > { %v852_v28 = vsel %vm849_vm6, %v1293_v27, %v680_v18 }
 0x124   : > { %v760_v39 = vpop.permute.xlu0 %759 }
 0x125   : > { %v912_v56 = vsel %vm908_vm9, %v895_v22, %v760_v39 }
 0x126   : > { %v929_v23 = vsel %vm925_vm10, %v912_v56, %v779_v9 }
 0x127   : > { %v836_v14 = vpop.permute.xlu1 %835  ;;  %v946_v24 = vsel %vm942_vm11, %v929_v23, %v798_v21 }
 0x129   : > { %v758_v25 = vpop.permute.xlu2 %757 }
 0x12c   : > { %v817_v3 = vpop.permute.xlu0 %816 }
 0x12d   : > { %v963_v26 = vsel %vm959_vm12, %v946_v24, %v817_v3 }
 0x12e   : > { %v980_v50 = vsel %vm976_vm13, %v963_v26, %v836_v14 }
 0x12f   : > { %v1000_v45 = vsel %vm994_vm14, %v980_v50, 0  ;;  %v739_v35 = vpop.permute.xlu1 %738 }
 0x130   : > { %1020 = vmatpush.bf16.xpose.msra.mxu0 %v1000_v45 }
 0x131   : > { %v815_v52 = vpop.permute.xlu2 %814 }
 0x134   : > { %v720_v34 = vpop.permute.xlu0 %719 }
 0x135   : > { %v876_v36 = vsel %vm874_vm7, %v852_v28, %v720_v34 }
 0x136   : > { %v893_v1 = vsel %vm891_vm8, %v876_v36, %v739_v35 }
 0x137   : > { %v910_v4 = vsel %vm908_vm9, %v893_v1, %v758_v25  ;;  %v796_v42 = vpop.permute.xlu1 %795 }
 0x13c   : > { %v777_v13 = vpop.permute.xlu0 %776 }
 0x13d   : > { %v927_v12 = vsel %vm925_vm10, %v910_v4, %v777_v13 }
 0x13e   : > { %v944_v30 = vsel %vm942_vm11, %v927_v12, %v796_v42 }
 0x13f   : > { %v961_v43 = vsel %vm959_vm12, %v944_v30, %v815_v52 }
 0x144   : > { %v834_v44 = vpop.permute.xlu0 %833 }
 0x145   : > { %v978_v46 = vsel %vm976_vm13, %v961_v43, %v834_v44 }
 0x146   : > { %v998_v37 = vsel %vm994_vm14, %v978_v46, 0 }
 0x147   : > { %1021 = vmatpush.bf16.xpose.msra.mxu0 %v998_v37 }
 0x14e   : > { %1286 = vmatmul.msk.bf16.vlgmr.msra.gmra.mxu0 %vm994_vm14, %v993_v47 }
 0x1cb   : > { %v1023_v48 = vpop.f32.mrf.mxu0 }
 0x1cc   : > { %1028 = vadd.xlane.f32.xlu1 %v1023_v48  ;;  %v1032_v32 = vmul.f32 %v1023_v48, %v1023_v48  ;;  %1027 = vst [vmem:[%s209_s9] sm:$0xff] %v1023_v48 }
 0x1cd   : > { %1410 = shalt.err (!%p1407_p6)
}
 0x1ce   : > { %1304 = dma.vmem_to_hbm [thread:$0]  (%p1563_p3), %s1068_s10, 128, %s1070_s0, %s1037_s11   ;;  %1033 = vadd.xlane.f32.xlu2 %v1032_v32  ;;  %vm1030_vm15 = vcmask 7168  }
 0x1cf   : > { %p237_p7 = scmp.lt.s32.totalorder %s1461_s18, 1  ;;  %s1229_s23 = sshll.u32 %s1585_s8, 1 }
 0x1d1   : > { %s2123_s18 = smov (!%p237_p7, %s1461_s18), 1 }
 0x1d2   : > { %s240_s5 = sadd.s32 %s1229_s23, %s2123_s18 }
 0x1d3   : > { %v1025_v38 = vpop.f32.mrf.mxu0  ;;  %s1230_s6 = sshll.u32 %s240_s5, 3 }
 0x1d4   : > { %s242_s19 = scalar_lea.vmem %s2099_s3, %s1230_s6  ;;  %s250_s28 = scalar_lea.vmem %s2100_s4, %s1230_s6 }
 0x23f   : > { %v1029_v49 = vpop.xlane.xlu1 %1028 }
 0x240   : > { %1031 = vst.msk [vmem:[%s242_s19] sm:$0xff] %vm1030_vm15, %v1029_v49 }
 0x241   : > { %v1034_v51 = vpop.xlane.xlu2 %1033 }
 0x242   : > { %1035 = vst.msk [vmem:[%s250_s28] sm:$0xff] %vm1030_vm15, %v1034_v51 }
 0x243 PF: > { %p1310_p3 = scmp.ge.s32.totalorder %s1477_s22, 2  ;;  %s1087_s0 = sand.u32 1, %s1449_s15  }
 0x244   : > { %s1088_s18 = scalar_lea.sflag [#allocation3], %s1087_s0 }
 0x245   : > { %p1307_p9 = pnand %p1310_p3, %p1572_p8 }
 0x247   : > { %p1308_p10 = pneg %p1307_p9 }
 0x249   : > { %1444 = dma.done.wait (%p1308_p10), %s1088_s18, 128  }
 0x24a   : > { %1446 = vsyncadd (%p1308_p10), %s1088_s18, 4294967168  ;;  %s18_s22 = sadd.s32 1, %s1477_s22   ;;  %s2109_s15 = smov %s1453_s16 }
 0x24b   : > { %p15_p11 = scmp.ge.s32.totalorder %s18_s22, 6   ;;  %s2110_s16 = smov %s1457_s17 }
 0x24c   : > { %s2111_s17 = smov %s1581_s7  ;;  %s2112_s18 = smov %s1469_s20 }
 0x24d   : > { %s2113_s19 = smov %s1473_s21  ;;  %s2114_s20 = smov %s2117_s25 }
 0x24e   : > { %s2115_s21 = smov %s2121_s26  ;;  %17 = sbr.rel (!%p15_p11) target bundleno = 7 (0x7), region = 88 }
 0x253   :  { %1116 = vsyncpa [#allocation3], 1 }
 0x254   :  { %1118 = vsyncpa [#allocation3 + $0x1], 1 }

</bundles_post_ra>
